<compile_context>
chip_gen: v6e
topology: v6e:2x2x1
jax: 0.10.0
libtpu: 0.0.40
codegen_flags: <defaults>
</compile_context>

<pallas_src>
import numpy as np
import jax
import jax.numpy as jnp
from jax import lax
from jax.experimental import pallas as pl
from jax.experimental.pallas import tpu as pltpu


# -----------------------------------------------------------------------------
# Host-side weight repacking (pure layout plumbing, done ONCE in build_resblock).
# -----------------------------------------------------------------------------
def _pack_banded_conv_weight(w, w_in_size, w_out_size, stride, pad):
    """(KH, KW, Cin, Cout) -> (KH, w_in_size*Cin, w_out_size*Cout) banded weights.

    B[kh][(wo*stride+kw-pad)*Cin + ci, wo*Cout + co] = w[kh, kw, ci, co]
    whenever 0 <= wo*stride+kw-pad < w_in_size (W padding by omission).
    """
    w = np.asarray(w, np.float32)
    KH, KW, Cin, Cout = w.shape
    B = np.zeros((KH, w_in_size * Cin, w_out_size * Cout), np.float32)
    for kh in range(KH):
        for kw in range(KW):
            for wo in range(w_out_size):
                w_in = wo * stride + kw - pad
                if 0 <= w_in < w_in_size:
                    B[kh, w_in * Cin:(w_in + 1) * Cin,
                      wo * Cout:(wo + 1) * Cout] = w[kh, kw]
    return B


def _pack_banded_identity(wi, w_in_size, w_out_size, stride):
    """(Cin, Cout) 1x1-conv weight -> (w_in_size*Cin, w_out_size*Cout) banded."""
    wi = np.asarray(wi, np.float32)
    Cin, Cout = wi.shape
    B = np.zeros((w_in_size * Cin, w_out_size * Cout), np.float32)
    for wo in range(w_out_size):
        w_in = wo * stride
        B[w_in * Cin:(w_in + 1) * Cin, wo * Cout:(wo + 1) * Cout] = wi
    return B


def _group_mean_matrix(w_out_size, Cout, n_reduce):
    """(L, L): (lane column-sums) @ G == per-channel mean, broadcast to lanes."""
    L = w_out_size * Cout
    a = np.arange(L)
    return ((a[:, None] % Cout) == (a[None, :] % Cout)).astype(np.float32) / float(n_reduce)


# -----------------------------------------------------------------------------
# Kernel
# -----------------------------------------------------------------------------
def _make_resblock_kernel(N, Ho, KH, pad, L, Kx, eps):
    """Static shapes closed over. Activations carried as (M2, L) = (N*Ho, Wo*Cout)."""
    f32 = jnp.float32
    M2 = N * Ho
    shifts = [pad - kh for kh in range(KH)]   # in kh order (matches weight packing)

    def tap(v, shift):
        # Rows of v shifted by `shift` with zero fill at per-image boundaries:
        # row (n, ho) of the result is v[n, ho - shift] if 0 <= ho - shift < Ho else 0.
        if shift == 0:
            return v
        rolled = pltpu.roll(v, shift % M2, axis=0)            # XLU sublane rotate
        ho = lax.broadcasted_iota(jnp.int32, v.shape, 0) % Ho
        valid = (ho >= shift) if shift > 0 else (ho < Ho + shift)
        return jnp.where(valid, rolled, 0.0)

    def taps(v):
        # Concatenate all KH row-tap patches along lanes -> (M2, KH * v.shape[1]).
        return jnp.concatenate([tap(v, s) for s in shifts], axis=1)

    def kernel(x_ref, w1_ref, w2gm_ref, vec_ref, out_ref):
        x = x_ref[...]                                        # (M2, Kx)   f32
        w1 = w1_ref[...].astype(f32)                          # (KH*Kx, 2L)
        w2gm = w2gm_ref[...].astype(f32)                      # ((KH+1)*L, L)
        w2 = w2gm[:KH * L]                                    # (KH*L, L)
        gm = w2gm[KH * L:]                                    # (L, L), scaled 1/(N*Ho*Wo)
        vec = vec_ref[...]                                    # (8, L)
        g1f, be1f, g2f, be2f, bif = (vec[0:1], vec[1:2], vec[2:3], vec[3:4], vec[4:5])

        def bn(acc, gf, bf):
            # One-pass batch-stat BN; per-channel reduce + lane broadcast via one
            # (2,L)x(L,L) matmul against the group-mean matrix.
            colsum = jnp.sum(acc, axis=0, keepdims=True)
            colsq = jnp.sum(acc * acc, axis=0, keepdims=True)
            stats = jnp.dot(jnp.concatenate([colsum, colsq], axis=0), gm,
                            preferred_element_type=f32)       # (2, L)
            mean = stats[0:1]
            var = jnp.maximum(stats[1:2] - mean * mean, 0.0)  # clamp cancellation
            scale = gf * lax.rsqrt(var + eps)
            offset = bf - mean * scale
            return acc * scale + offset

        # ---- conv1 + identity 1x1: single GEMM over all row taps ---------------
        fused = jnp.dot(taps(x), w1, preferred_element_type=f32)     # (M2, 2L)
        identity = fused[:, L:] + bif
        # conv bias b1 omitted: cancels exactly under batch-stat BN.
        h1 = jnp.maximum(bn(fused[:, :L], g1f, be1f), 0.0)           # (M2, L)

        # ---- conv2: single GEMM over all row taps (halo via roll+mask) ---------
        acc2 = jnp.dot(taps(h1), w2, preferred_element_type=f32)     # (M2, L)
        # conv bias b2 omitted: cancels exactly under batch-stat BN.
        h2 = bn(acc2, g2f, be2f)

        out_ref[...] = jnp.maximum(h2 + identity, 0.0)               # full-width store

    return kernel


# -----------------------------------------------------------------------------
# Builder: packs weights once, returns a jitted apply(x) -> (N, Ho, Wo, Cout).
# -----------------------------------------------------------------------------
def build_resblock(params, x_shape, *, kernel_size, stride, padding, eps=1e-5):
    N, H, W, Cin = x_shape
    w1, b1, g1, be1, w2, b2, g2, be2, wi, bi = params
    KH, KW, _, Cout = w1.shape
    assert KH == kernel_size and KW == kernel_size
    s, p = stride, padding
    Ho = (H + 2 * p - KH) // s + 1
    Wo = (W + 2 * p - KW) // s + 1
    # The in-kernel sublane-roll halo requires stride 1 and "same" row count.
    # TODO(synk): support stride > 1 / non-"same" padding via a strided row gather.
    assert s == 1 and Ho == H and Wo == W, "only stride=1 'same' convs supported"

    Kx = W * Cin          # folded input lane width
    L = Wo * Cout         # folded output lane width
    M2 = N * Ho           # GEMM rows
    Mtot = N * Ho * Wo    # BN reduction count

    # ---- banded weights (host, once) ------------------------------------------
    B1 = _pack_banded_conv_weight(w1, W, Wo, s, p)       # (KH, Kx, L)
    Bi = _pack_banded_identity(wi, W, Wo, s)             # (Kx, L)
    B2 = _pack_banded_conv_weight(w2, Wo, Wo, 1, p)      # (KH, L, L)
    gm = _group_mean_matrix(Wo, Cout, Mtot)              # (L, L)

    # conv1 + identity fused weight: rows ordered by kh, identity on centre tap.
    W1 = np.zeros((KH * Kx, 2 * L), np.float32)
    for kh in range(KH):
        W1[kh * Kx:(kh + 1) * Kx, :L] = B1[kh]
    W1[p * Kx:(p + 1) * Kx, L:] = Bi
    # conv2 weight with the group-mean matrix appended (one contiguous buffer).
    W2gm = np.concatenate([B2.reshape(KH * L, L), gm], axis=0)   # ((KH+1)*L, L)

    # per-lane BN/bias vectors packed into one sublane-padded (8, L) slab.
    def tile_lane(v):   # (Cout,) -> (L,), lane index wo*Cout + c -> v[c]
        return np.tile(np.asarray(v, np.float32), Wo)
    vecs = np.zeros((8, L), np.float32)
    for i, v in enumerate((g1, be1, g2, be2, bi)):
        vecs[i] = tile_lane(v)

    # bf16 storage for the matmul operands: MXU rounds to bf16 at default
    # precision anyway, so this only halves the dominant weight DMA bytes.
    w1_dev = jnp.asarray(W1, jnp.bfloat16)
    w2gm_dev = jnp.asarray(W2gm, jnp.bfloat16)
    vec_dev = jnp.asarray(vecs, jnp.float32)

    kernel = _make_resblock_kernel(N, Ho, KH, p, L, Kx, eps)

    def full_spec(shape):
        nd = len(shape)
        return pl.BlockSpec(shape, lambda i, _nd=nd: (0,) * _nd)

    # TODO(synk): for ResNet-scale shapes, tile M2 (N*Ho rows) over a "parallel"
    # grid axis (2 TCs on v7x) with a two-pass BN (stats accumulate + finalize);
    # at this toy size (<1 MiB working set) grid=(1,) is optimal.
    call = pl.pallas_call(
        kernel,
        out_shape=jax.ShapeDtypeStruct((M2, L), jnp.float32),
        grid_spec=pltpu.PrefetchScalarGridSpec(
            num_scalar_prefetch=0,
            grid=(1,),
            in_specs=[full_spec((M2, Kx)), full_spec(w1_dev.shape),
                      full_spec(w2gm_dev.shape), full_spec(vec_dev.shape)],
            out_specs=full_spec((M2, L))),
        compiler_params=pltpu.CompilerParams(
            dimension_semantics=("arbitrary",)),
    )

    @jax.jit
    def apply_fn(x):
        xm = x.reshape(M2, Kx)                     # fold (W, Cin) into lanes
        out = call(xm, w1_dev, w2gm_dev, vec_dev)  # (M2, L)
        return out.reshape(N, Ho, Wo, Cout)

    return apply_fn


# -----------------------------------------------------------------------------
# Pure-JAX reference (NHWC), mirrors the PyTorch training-mode forward.
# -----------------------------------------------------------------------------
def resblock_reference(x, params, *, stride, padding, eps=1e-5):
    w1, b1, g1, be1, w2, b2, g2, be2, wi, bi = params
    dn = ('NHWC', 'HWIO', 'NHWC')
    HIGH = jax.lax.Precision.HIGHEST

    def conv(v, w, s, p):
        return jax.lax.conv_general_dilated(
            v, w, (s, s), [(p, p), (p, p)], dimension_numbers=dn, precision=HIGH)

    def bn(v, g, b):
        m = v.mean(axis=(0, 1, 2))
        var = ((v - m) ** 2).mean(axis=(0, 1, 2))
        return (v - m) * jax.lax.rsqrt(var + eps) * g + b

    Cin, Cout = wi.shape
    identity = conv(x, wi.reshape(1, 1, Cin, Cout), stride, 0) + bi
    out = conv(x, w1, stride, padding) + b1
    out = jnp.maximum(bn(out, g1, be1), 0.0)
    out = conv(out, w2, 1, padding) + b2
    out = bn(out, g2, be2) + identity
    return jnp.maximum(out, 0.0)


if __name__ == "__main__":
    N, Cin, Cout, H, W = 2, 4, 8, 16, 16
    ksz, stride, padding = 3, 1, 1

    key = jax.random.PRNGKey(0)
    ks = jax.random.split(key, 11)
    x = jax.random.normal(ks[0], (N, H, W, Cin), jnp.float32)
    w1 = 0.2 * jax.random.normal(ks[1], (ksz, ksz, Cin, Cout), jnp.float32)
    b1 = 0.1 * jax.random.normal(ks[2], (Cout,), jnp.float32)
    w2 = 0.2 * jax.random.normal(ks[3], (ksz, ksz, Cout, Cout), jnp.float32)
    b2 = 0.1 * jax.random.normal(ks[4], (Cout,), jnp.float32)
    wi = 0.2 * jax.random.normal(ks[5], (Cin, Cout), jnp.float32)
    bi = 0.1 * jax.random.normal(ks[6], (Cout,), jnp.float32)
    g1 = 1.0 + 0.1 * jax.random.normal(ks[7], (Cout,), jnp.float32)
    be1 = 0.1 * jax.random.normal(ks[8], (Cout,), jnp.float32)
    g2 = 1.0 + 0.1 * jax.random.normal(ks[9], (Cout,), jnp.float32)
    be2 = 0.1 * jax.random.normal(ks[10], (Cout,), jnp.float32)
    params = (w1, b1, g1, be1, w2, b2, g2, be2, wi, bi)

    apply_fn = build_resblock(params, x.shape,
                              kernel_size=ksz, stride=stride, padding=padding)
    out = jax.block_until_ready(apply_fn(x))

    ref = resblock_reference(x, params, stride=stride, padding=padding)
    assert out.shape == (N, H, W, Cout)
    # Tolerance covers default-precision (bf16-rounded) MXU passes vs the
    # Precision.HIGHEST reference.
    err = np.max(np.abs(np.asarray(out) - np.asarray(ref)))
    assert np.allclose(np.asarray(out), np.asarray(ref), atol=3e-2, rtol=3e-2), err
    print("KERNEL_OK")
</pallas_src>

<mosaic_0001>
module attributes {stable_mosaic.version = 11 : i64} {
  func.func @kernel(%arg0: i32, %arg1: memref<32x64xf32, #tpu.memory_space<vmem>>, %arg2: memref<192x256xbf16, #tpu.memory_space<vmem>>, %arg3: memref<512x128xbf16, #tpu.memory_space<vmem>>, %arg4: memref<8x128xf32, #tpu.memory_space<vmem>>, %arg5: memref<32x128xf32, #tpu.memory_space<vmem>>) attributes {dimension_semantics = [#tpu.dimension_semantics<arbitrary>], iteration_bounds = array<i64: 1>, scalar_prefetch = 0 : i64, scratch_operands = 0 : i64, tpu.core_type = #tpu.core_type<tc>, window_params = [{pipeline_mode = #tpu.pipeline_mode<synchronous>, transform_indices = @transform_0, window_bounds = array<i64: 32, 64>}, {pipeline_mode = #tpu.pipeline_mode<synchronous>, transform_indices = @transform_1, window_bounds = array<i64: 192, 256>}, {pipeline_mode = #tpu.pipeline_mode<synchronous>, transform_indices = @transform_2, window_bounds = array<i64: 512, 128>}, {pipeline_mode = #tpu.pipeline_mode<synchronous>, transform_indices = @transform_3, window_bounds = array<i64: 8, 128>}, {pipeline_mode = #tpu.pipeline_mode<synchronous>, transform_indices = @transform_4, window_bounds = array<i64: 32, 128>}]} {
    %c0 = arith.constant 0 : index
    %c0_0 = arith.constant 0 : index
    %0 = vector.load %arg1[%c0, %c0_0] : memref<32x64xf32, #tpu.memory_space<vmem>>, vector<32x64xf32>
    %c0_1 = arith.constant 0 : index
    %c0_2 = arith.constant 0 : index
    %1 = vector.load %arg2[%c0_1, %c0_2] : memref<192x256xbf16, #tpu.memory_space<vmem>>, vector<192x256xbf16>
    %2 = arith.extf %1 : vector<192x256xbf16> to vector<192x256xf32>
    %c0_3 = arith.constant 0 : index
    %c0_4 = arith.constant 0 : index
    %3 = vector.load %arg3[%c0_3, %c0_4] : memref<512x128xbf16, #tpu.memory_space<vmem>>, vector<512x128xbf16>
    %4 = arith.extf %3 : vector<512x128xbf16> to vector<512x128xf32>
    %5 = vector.extract_strided_slice %4 {offsets = [0, 0], sizes = [384, 128], strides = [1, 1]} : vector<512x128xf32> to vector<384x128xf32>
    %6 = vector.extract_strided_slice %4 {offsets = [384, 0], sizes = [128, 128], strides = [1, 1]} : vector<512x128xf32> to vector<128x128xf32>
    %c0_5 = arith.constant 0 : index
    %c0_6 = arith.constant 0 : index
    %7 = vector.load %arg4[%c0_5, %c0_6] : memref<8x128xf32, #tpu.memory_space<vmem>>, vector<8x128xf32>
    %8 = vector.extract_strided_slice %7 {offsets = [0, 0], sizes = [1, 128], strides = [1, 1]} : vector<8x128xf32> to vector<1x128xf32>
    %9 = vector.extract_strided_slice %7 {offsets = [1, 0], sizes = [1, 128], strides = [1, 1]} : vector<8x128xf32> to vector<1x128xf32>
    %10 = vector.extract_strided_slice %7 {offsets = [2, 0], sizes = [1, 128], strides = [1, 1]} : vector<8x128xf32> to vector<1x128xf32>
    %11 = vector.extract_strided_slice %7 {offsets = [3, 0], sizes = [1, 128], strides = [1, 1]} : vector<8x128xf32> to vector<1x128xf32>
    %12 = vector.extract_strided_slice %7 {offsets = [4, 0], sizes = [1, 128], strides = [1, 1]} : vector<8x128xf32> to vector<1x128xf32>
    %c1_i32 = arith.constant 1 : i32
    %13 = tpu.dynamic_rotate %0 by %c1_i32 dim 0 : vector<32x64xf32>, i32 -> vector<32x64xf32>
    %14 = tpu.iota {dimensions = array<i32: 0>} : vector<32x64xi32>
    %c16_i32 = arith.constant 16 : i32
    %c0_i32 = arith.constant 0 : i32
    %15 = arith.cmpi eq, %c16_i32, %c0_i32 : i32
    %c1_i32_7 = arith.constant 1 : i32
    %16 = arith.select %15, %c1_i32_7, %c16_i32 : i32
    %17 = vector.broadcast %16 : i32 to vector<32x64xi32>
    %18 = arith.remsi %14, %17 : vector<32x64xi32>
    %c0_i32_8 = arith.constant 0 : i32
    %19 = vector.broadcast %c0_i32_8 : i32 to vector<32x64xi32>
    %20 = arith.cmpi ne, %18, %19 : vector<32x64xi32>
    %c0_i32_9 = arith.constant 0 : i32
    %21 = vector.broadcast %c0_i32_9 : i32 to vector<32x64xi32>
    %22 = arith.cmpi slt, %18, %21 : vector<32x64xi32>
    %c0_i32_10 = arith.constant 0 : i32
    %23 = arith.cmpi slt, %16, %c0_i32_10 : i32
    %24 = vector.broadcast %23 : i1 to vector<32x64xi1>
    %25 = vector.broadcast %24 : vector<32x64xi1> to vector<32x64xi1>
    %26 = arith.xori %22, %25 : vector<32x64xi1>
    %27 = arith.andi %26, %20 : vector<32x64xi1>
    %28 = vector.broadcast %16 : i32 to vector<32x64xi32>
    %29 = arith.addi %18, %28 : vector<32x64xi32>
    %30 = arith.select %27, %29, %18 : vector<32x64xi1>, vector<32x64xi32>
    %c1_i32_11 = arith.constant 1 : i32
    %31 = vector.broadcast %c1_i32_11 : i32 to vector<32x64xi32>
    %32 = arith.cmpi sge, %30, %31 : vector<32x64xi32>
    %cst = arith.constant 0.000000e+00 : f32
    %33 = vector.broadcast %cst : f32 to vector<32x64xf32>
    %34 = arith.select %32, %13, %33 : vector<32x64xi1>, vector<32x64xf32>
    %c31_i32 = arith.constant 31 : i32
    %35 = tpu.dynamic_rotate %0 by %c31_i32 dim 0 : vector<32x64xf32>, i32 -> vector<32x64xf32>
    %36 = tpu.iota {dimensions = array<i32: 0>} : vector<32x64xi32>
    %c16_i32_12 = arith.constant 16 : i32
    %c0_i32_13 = arith.constant 0 : i32
    %37 = arith.cmpi eq, %c16_i32_12, %c0_i32_13 : i32
    %c1_i32_14 = arith.constant 1 : i32
    %38 = arith.select %37, %c1_i32_14, %c16_i32_12 : i32
    %39 = vector.broadcast %38 : i32 to vector<32x64xi32>
    %40 = arith.remsi %36, %39 : vector<32x64xi32>
    %c0_i32_15 = arith.constant 0 : i32
    %41 = vector.broadcast %c0_i32_15 : i32 to vector<32x64xi32>
    %42 = arith.cmpi ne, %40, %41 : vector<32x64xi32>
    %c0_i32_16 = arith.constant 0 : i32
    %43 = vector.broadcast %c0_i32_16 : i32 to vector<32x64xi32>
    %44 = arith.cmpi slt, %40, %43 : vector<32x64xi32>
    %c0_i32_17 = arith.constant 0 : i32
    %45 = arith.cmpi slt, %38, %c0_i32_17 : i32
    %46 = vector.broadcast %45 : i1 to vector<32x64xi1>
    %47 = vector.broadcast %46 : vector<32x64xi1> to vector<32x64xi1>
    %48 = arith.xori %44, %47 : vector<32x64xi1>
    %49 = arith.andi %48, %42 : vector<32x64xi1>
    %50 = vector.broadcast %38 : i32 to vector<32x64xi32>
    %51 = arith.addi %40, %50 : vector<32x64xi32>
    %52 = arith.select %49, %51, %40 : vector<32x64xi1>, vector<32x64xi32>
    %c15_i32 = arith.constant 15 : i32
    %53 = vector.broadcast %c15_i32 : i32 to vector<32x64xi32>
    %54 = arith.cmpi slt, %52, %53 : vector<32x64xi32>
    %cst_18 = arith.constant 0.000000e+00 : f32
    %55 = vector.broadcast %cst_18 : f32 to vector<32x64xf32>
    %56 = arith.select %54, %35, %55 : vector<32x64xi1>, vector<32x64xf32>
    %57 = tpu.concatenate %34, %0, %56 in 1 : vector<32x64xf32>, vector<32x64xf32>, vector<32x64xf32> -> vector<32x192xf32>
    %cst_19 = arith.constant dense<0.000000e+00> : vector<32x256xf32>
    %58 = tpu.matmul %57, %2, %cst_19 {dimension_numbers = #tpu.dot_dimension_numbers<[1], [0], [0], [1], [0, 0, 1, 1], [], []>} : vector<32x192xf32>, vector<192x256xf32>, vector<32x256xf32> -> vector<32x256xf32>
    %59 = vector.extract_strided_slice %58 {offsets = [0, 128], sizes = [32, 128], strides = [1, 1]} : vector<32x256xf32> to vector<32x128xf32>
    %60 = vector.broadcast %12 : vector<1x128xf32> to vector<32x128xf32>
    %61 = arith.addf %59, %60 : vector<32x128xf32>
    %62 = vector.extract_strided_slice %58 {offsets = [0, 0], sizes = [32, 128], strides = [1, 1]} : vector<32x256xf32> to vector<32x128xf32>
    %cst_20 = arith.constant dense<0.000000e+00> : vector<128xf32>
    %63 = vector.multi_reduction <add>, %62, %cst_20 [0] : vector<32x128xf32> to vector<128xf32>
    %64 = vector.shape_cast %63 : vector<128xf32> to vector<1x128xf32>
    %65 = arith.mulf %62, %62 : vector<32x128xf32>
    %cst_21 = arith.constant dense<0.000000e+00> : vector<128xf32>
    %66 = vector.multi_reduction <add>, %65, %cst_21 [0] : vector<32x128xf32> to vector<128xf32>
    %67 = vector.shape_cast %66 : vector<128xf32> to vector<1x128xf32>
    %68 = tpu.concatenate %64, %67 in 0 : vector<1x128xf32>, vector<1x128xf32> -> vector<2x128xf32>
    %cst_22 = arith.constant dense<0.000000e+00> : vector<2x128xf32>
    %69 = tpu.matmul %68, %6, %cst_22 {dimension_numbers = #tpu.dot_dimension_numbers<[1], [0], [0], [1], [0, 0, 1, 1], [], []>} : vector<2x128xf32>, vector<128x128xf32>, vector<2x128xf32> -> vector<2x128xf32>
    %70 = vector.extract_strided_slice %69 {offsets = [0, 0], sizes = [1, 128], strides = [1, 1]} : vector<2x128xf32> to vector<1x128xf32>
    %71 = vector.extract_strided_slice %69 {offsets = [1, 0], sizes = [1, 128], strides = [1, 1]} : vector<2x128xf32> to vector<1x128xf32>
    %72 = arith.mulf %70, %70 : vector<1x128xf32>
    %73 = arith.subf %71, %72 : vector<1x128xf32>
    %cst_23 = arith.constant 0.000000e+00 : f32
    %74 = vector.broadcast %cst_23 : f32 to vector<1x128xf32>
    %75 = arith.maximumf %73, %74 : vector<1x128xf32>
    %cst_24 = arith.constant 9.99999974E-6 : f32
    %76 = vector.broadcast %cst_24 : f32 to vector<1x128xf32>
    %77 = arith.addf %75, %76 : vector<1x128xf32>
    %78 = math.rsqrt %77 : vector<1x128xf32>
    %79 = arith.mulf %8, %78 : vector<1x128xf32>
    %80 = arith.mulf %70, %79 : vector<1x128xf32>
    %81 = arith.subf %9, %80 : vector<1x128xf32>
    %82 = vector.broadcast %79 : vector<1x128xf32> to vector<32x128xf32>
    %83 = arith.mulf %62, %82 : vector<32x128xf32>
    %84 = vector.broadcast %81 : vector<1x128xf32> to vector<32x128xf32>
    %85 = arith.addf %83, %84 : vector<32x128xf32>
    %cst_25 = arith.constant 0.000000e+00 : f32
    %86 = vector.broadcast %cst_25 : f32 to vector<32x128xf32>
    %87 = arith.maximumf %85, %86 : vector<32x128xf32>
    %c1_i32_26 = arith.constant 1 : i32
    %88 = tpu.dynamic_rotate %87 by %c1_i32_26 dim 0 : vector<32x128xf32>, i32 -> vector<32x128xf32>
    %89 = tpu.iota {dimensions = array<i32: 0>} : vector<32x128xi32>
    %c16_i32_27 = arith.constant 16 : i32
    %c0_i32_28 = arith.constant 0 : i32
    %90 = arith.cmpi eq, %c16_i32_27, %c0_i32_28 : i32
    %c1_i32_29 = arith.constant 1 : i32
    %91 = arith.select %90, %c1_i32_29, %c16_i32_27 : i32
    %92 = vector.broadcast %91 : i32 to vector<32x128xi32>
    %93 = arith.remsi %89, %92 : vector<32x128xi32>
    %c0_i32_30 = arith.constant 0 : i32
    %94 = vector.broadcast %c0_i32_30 : i32 to vector<32x128xi32>
    %95 = arith.cmpi ne, %93, %94 : vector<32x128xi32>
    %c0_i32_31 = arith.constant 0 : i32
    %96 = vector.broadcast %c0_i32_31 : i32 to vector<32x128xi32>
    %97 = arith.cmpi slt, %93, %96 : vector<32x128xi32>
    %c0_i32_32 = arith.constant 0 : i32
    %98 = arith.cmpi slt, %91, %c0_i32_32 : i32
    %99 = vector.broadcast %98 : i1 to vector<32x128xi1>
    %100 = vector.broadcast %99 : vector<32x128xi1> to vector<32x128xi1>
    %101 = arith.xori %97, %100 : vector<32x128xi1>
    %102 = arith.andi %101, %95 : vector<32x128xi1>
    %103 = vector.broadcast %91 : i32 to vector<32x128xi32>
    %104 = arith.addi %93, %103 : vector<32x128xi32>
    %105 = arith.select %102, %104, %93 : vector<32x128xi1>, vector<32x128xi32>
    %c1_i32_33 = arith.constant 1 : i32
    %106 = vector.broadcast %c1_i32_33 : i32 to vector<32x128xi32>
    %107 = arith.cmpi sge, %105, %106 : vector<32x128xi32>
    %cst_34 = arith.constant 0.000000e+00 : f32
    %108 = vector.broadcast %cst_34 : f32 to vector<32x128xf32>
    %109 = arith.select %107, %88, %108 : vector<32x128xi1>, vector<32x128xf32>
    %c31_i32_35 = arith.constant 31 : i32
    %110 = tpu.dynamic_rotate %87 by %c31_i32_35 dim 0 : vector<32x128xf32>, i32 -> vector<32x128xf32>
    %111 = tpu.iota {dimensions = array<i32: 0>} : vector<32x128xi32>
    %c16_i32_36 = arith.constant 16 : i32
    %c0_i32_37 = arith.constant 0 : i32
    %112 = arith.cmpi eq, %c16_i32_36, %c0_i32_37 : i32
    %c1_i32_38 = arith.constant 1 : i32
    %113 = arith.select %112, %c1_i32_38, %c16_i32_36 : i32
    %114 = vector.broadcast %113 : i32 to vector<32x128xi32>
    %115 = arith.remsi %111, %114 : vector<32x128xi32>
    %c0_i32_39 = arith.constant 0 : i32
    %116 = vector.broadcast %c0_i32_39 : i32 to vector<32x128xi32>
    %117 = arith.cmpi ne, %115, %116 : vector<32x128xi32>
    %c0_i32_40 = arith.constant 0 : i32
    %118 = vector.broadcast %c0_i32_40 : i32 to vector<32x128xi32>
    %119 = arith.cmpi slt, %115, %118 : vector<32x128xi32>
    %c0_i32_41 = arith.constant 0 : i32
    %120 = arith.cmpi slt, %113, %c0_i32_41 : i32
    %121 = vector.broadcast %120 : i1 to vector<32x128xi1>
    %122 = vector.broadcast %121 : vector<32x128xi1> to vector<32x128xi1>
    %123 = arith.xori %119, %122 : vector<32x128xi1>
    %124 = arith.andi %123, %117 : vector<32x128xi1>
    %125 = vector.broadcast %113 : i32 to vector<32x128xi32>
    %126 = arith.addi %115, %125 : vector<32x128xi32>
    %127 = arith.select %124, %126, %115 : vector<32x128xi1>, vector<32x128xi32>
    %c15_i32_42 = arith.constant 15 : i32
    %128 = vector.broadcast %c15_i32_42 : i32 to vector<32x128xi32>
    %129 = arith.cmpi slt, %127, %128 : vector<32x128xi32>
    %cst_43 = arith.constant 0.000000e+00 : f32
    %130 = vector.broadcast %cst_43 : f32 to vector<32x128xf32>
    %131 = arith.select %129, %110, %130 : vector<32x128xi1>, vector<32x128xf32>
    %132 = tpu.concatenate %109, %87, %131 in 1 : vector<32x128xf32>, vector<32x128xf32>, vector<32x128xf32> -> vector<32x384xf32>
    %cst_44 = arith.constant dense<0.000000e+00> : vector<32x128xf32>
    %133 = tpu.matmul %132, %5, %cst_44 {dimension_numbers = #tpu.dot_dimension_numbers<[1], [0], [0], [1], [0, 0, 1, 1], [], []>} : vector<32x384xf32>, vector<384x128xf32>, vector<32x128xf32> -> vector<32x128xf32>
    %cst_45 = arith.constant dense<0.000000e+00> : vector<128xf32>
    %134 = vector.multi_reduction <add>, %133, %cst_45 [0] : vector<32x128xf32> to vector<128xf32>
    %135 = vector.shape_cast %134 : vector<128xf32> to vector<1x128xf32>
    %136 = arith.mulf %133, %133 : vector<32x128xf32>
    %cst_46 = arith.constant dense<0.000000e+00> : vector<128xf32>
    %137 = vector.multi_reduction <add>, %136, %cst_46 [0] : vector<32x128xf32> to vector<128xf32>
    %138 = vector.shape_cast %137 : vector<128xf32> to vector<1x128xf32>
    %139 = tpu.concatenate %135, %138 in 0 : vector<1x128xf32>, vector<1x128xf32> -> vector<2x128xf32>
    %cst_47 = arith.constant dense<0.000000e+00> : vector<2x128xf32>
    %140 = tpu.matmul %139, %6, %cst_47 {dimension_numbers = #tpu.dot_dimension_numbers<[1], [0], [0], [1], [0, 0, 1, 1], [], []>} : vector<2x128xf32>, vector<128x128xf32>, vector<2x128xf32> -> vector<2x128xf32>
    %141 = vector.extract_strided_slice %140 {offsets = [0, 0], sizes = [1, 128], strides = [1, 1]} : vector<2x128xf32> to vector<1x128xf32>
    %142 = vector.extract_strided_slice %140 {offsets = [1, 0], sizes = [1, 128], strides = [1, 1]} : vector<2x128xf32> to vector<1x128xf32>
    %143 = arith.mulf %141, %141 : vector<1x128xf32>
    %144 = arith.subf %142, %143 : vector<1x128xf32>
    %cst_48 = arith.constant 0.000000e+00 : f32
    %145 = vector.broadcast %cst_48 : f32 to vector<1x128xf32>
    %146 = arith.maximumf %144, %145 : vector<1x128xf32>
    %cst_49 = arith.constant 9.99999974E-6 : f32
    %147 = vector.broadcast %cst_49 : f32 to vector<1x128xf32>
    %148 = arith.addf %146, %147 : vector<1x128xf32>
    %149 = math.rsqrt %148 : vector<1x128xf32>
    %150 = arith.mulf %10, %149 : vector<1x128xf32>
    %151 = arith.mulf %141, %150 : vector<1x128xf32>
    %152 = arith.subf %11, %151 : vector<1x128xf32>
    %153 = vector.broadcast %150 : vector<1x128xf32> to vector<32x128xf32>
    %154 = arith.mulf %133, %153 : vector<32x128xf32>
    %155 = vector.broadcast %152 : vector<1x128xf32> to vector<32x128xf32>
    %156 = arith.addf %154, %155 : vector<32x128xf32>
    %157 = arith.addf %156, %61 : vector<32x128xf32>
    %cst_50 = arith.constant 0.000000e+00 : f32
    %158 = vector.broadcast %cst_50 : f32 to vector<32x128xf32>
    %159 = arith.maximumf %157, %158 : vector<32x128xf32>
    %c0_51 = arith.constant 0 : index
    %c0_52 = arith.constant 0 : index
    %160 = vector.load %arg5[%c0_51, %c0_52] : memref<32x128xf32, #tpu.memory_space<vmem>>, vector<32x128xf32>
    tpu.vector_store %arg5[%c0_51, %c0_52], %159 {strides = array<i32>} : memref<32x128xf32, #tpu.memory_space<vmem>>, vector<32x128xf32>,
    return
  }
  func.func @transform_0(%arg0: i32) -> (i32, i32) {
    %c0_i32 = arith.constant 0 : i32
    %c0_i32_0 = arith.constant 0 : i32
    %c0_i32_1 = arith.constant 0 : i32
    return %c0_i32, %c0_i32_0 : i32, i32
  }
  func.func @transform_1(%arg0: i32) -> (i32, i32) {
    %c0_i32 = arith.constant 0 : i32
    %c0_i32_0 = arith.constant 0 : i32
    %c0_i32_1 = arith.constant 0 : i32
    return %c0_i32, %c0_i32_0 : i32, i32
  }
  func.func @transform_2(%arg0: i32) -> (i32, i32) {
    %c0_i32 = arith.constant 0 : i32
    %c0_i32_0 = arith.constant 0 : i32
    %c0_i32_1 = arith.constant 0 : i32
    return %c0_i32, %c0_i32_0 : i32, i32
  }
  func.func @transform_3(%arg0: i32) -> (i32, i32) {
    %c0_i32 = arith.constant 0 : i32
    %c0_i32_0 = arith.constant 0 : i32
    %c0_i32_1 = arith.constant 0 : i32
    return %c0_i32, %c0_i32_0 : i32, i32
  }
  func.func @transform_4(%arg0: i32) -> (i32, i32) {
    %c0_i32 = arith.constant 0 : i32
    %c0_i32_0 = arith.constant 0 : i32
    %c0_i32_1 = arith.constant 0 : i32
    return %c0_i32, %c0_i32_0 : i32, i32
  }
}

</mosaic_0001>

<bundles_post_ra>
// kernel: apply_fn.1
= control target key start
LH: loop header
LB: loop body
LE: loop exit
PB: predicated region body
PF: predicated region fallthrough
CT: control target
= control target key end

     0   :  { %s1289_s19 = smov 64   ;;  %v226_v21 = vlaneseq  ;;  %vm325_vm0 = vcmask 523264   ;;  %v1290_v41 = vmov 0.0   ;;  %vm1291_vm7 = vmmov 0   ;;  %s1815_s0 = inlined_call_operand.vmem [shape: f32[32,64], index: 0, kind: input, shape index: {}]   ;;  %s1816_s1 = inlined_call_operand.vmem [shape: bf16[192,256], index: 1, kind: input, shape index: {}]   ;;  %s1817_s2 = inlined_call_operand.vmem [shape: bf16[512,128], index: 2, kind: input, shape index: {}]   ;;  %s1818_s3 = inlined_call_operand.vmem [shape: f32[8,128], index: 3, kind: input, shape index: {}]   ;;  %s1819_s4 = inlined_call_operand.vmem [shape: f32[32,128], index: 4, kind: output, shape index: {}]  }
   0x1   :  { %v1320_v0 = vld [vmem:[%s1815_s0] sm:$0xff]  ;;  %v1325_v1 = vld [vmem:[%s1815_s0 + $0x10] sm:$0xff]  ;;  %v36_v2 = vld [vmem:[%s1816_s1 + $0x78] sm:$0xff]  ;;  %1174 = vmatprep.subr.mxu1 %v1290_v41  ;;  %1206 = vmatprep.mubr.msk.f32.mxu1 %vm1291_vm7, %v1290_v41  ;;  %vm461_vm8 = vcmask 1040384  }
   0x2   :  { %313 = vrot.lane.b32.xlu0 %v1320_v0, %s1289_s19  ;;  %317 = vrot.lane.b32.xlu1 %v1325_v1, %s1289_s19  ;;  %v1335_v3 = vld [vmem:[%s1815_s0 + $0x8] sm:$0xff]  ;;  %v1340_v4 = vld [vmem:[%s1815_s0 + $0x18] sm:$0xff]  ;;  %v76_v6 = vunpack.c.h.bf16 %v36_v2  ;;  %v75_v7 = vunpack.c.l.bf16 %v36_v2  ;;  %v222_v22 = vrot.slane %v1320_v0, 7  ;;  %v292_v23 = vrot.slane %v1320_v0, 1 }
   0x3   :  { %v35_v5 = vld [vmem:[%s1816_s1 + $0x70] sm:$0xff]  ;;  %v34_v8 = vld [vmem:[%s1816_s1 + $0x68] sm:$0xff]  ;;  %v33_v11 = vld [vmem:[%s1816_s1 + $0x60] sm:$0xff]  ;;  %v223_v26 = vrot.slane %v1335_v3, 7  ;;  %v293_v27 = vrot.slane %v1335_v3, 1  ;;  %v224_v28 = vrot.slane %v1325_v1, 7 }
   0x4   :  { %v74_v9 = vunpack.c.h.bf16 %v35_v5  ;;  %v73_v10 = vunpack.c.l.bf16 %v35_v5  ;;  %342 = vmatprep.subr.mxu0 %v76_v6  ;;  %v72_v12 = vunpack.c.h.bf16 %v34_v8  ;;  %v71_v13 = vunpack.c.l.bf16 %v34_v8  ;;  %v32_v14 = vld [vmem:[%s1816_s1 + $0x58] sm:$0xff]  ;;  %v31_v17 = vld [vmem:[%s1816_s1 + $0x50] sm:$0xff]  ;;  %v30_v20 = vld [vmem:[%s1816_s1 + $0x48] sm:$0xff] }
   0x5   :  { %343 = vmatpush1.msra.mxu0 %v75_v7  ;;  %v70_v15 = vunpack.c.h.bf16 %v33_v11  ;;  %v69_v16 = vunpack.c.l.bf16 %v33_v11  ;;  %v68_v18 = vunpack.c.h.bf16 %v32_v14  ;;  %v67_v19 = vunpack.c.l.bf16 %v32_v14  ;;  %v1367_v25 = vld [vmem:[%s1817_s2 + $0xf8] sm:$0xff]   ;;  %v29_v30 = vld [vmem:[%s1816_s1 + $0x40] sm:$0xff]  ;;  %v27_v43 = vld [vmem:[%s1816_s1 + $0x30] sm:$0xff] }
   0x6   :  { %315 = vrot.lane.b32.xlu0 %v1335_v3, %s1289_s19  ;;  %319 = vrot.lane.b32.xlu1 %v1340_v4, %s1289_s19  ;;  %v66_v24 = vunpack.c.h.bf16 %v31_v17  ;;  %v65_v29 = vunpack.c.l.bf16 %v31_v17  ;;  %v294_v31 = vrot.slane %v1325_v1, 1  ;;  %v225_v32 = vrot.slane %v1340_v4, 7  ;;  %v28_v35 = vld [vmem:[%s1816_s1 + $0x38] sm:$0xff]  ;;  %v26_v50 = vld [vmem:[%s1816_s1 + $0x28] sm:$0xff] }
   0x7   :  { %344 = vmatprep.subr.mxu0 %v74_v9  ;;  %v295_v33 = vrot.slane %v1340_v4, 1  ;;  %v64_v34 = vunpack.c.h.bf16 %v30_v20  ;;  %v63_v36 = vunpack.c.l.bf16 %v30_v20  ;;  %v1381_v37 = vshrl.u32 %v226_v21, 7  ;;  %v25_v56 = vld [vmem:[%s1816_s1 + $0x20] sm:$0xff]  ;;  %v24_v60 = vld [vmem:[%s1816_s1 + $0x18] sm:$0xff]  ;;  %v23_v63 = vld [vmem:[%s1816_s1 + $0x10] sm:$0xff] }
   0x8   :  { %345 = vmatpush1.msra.mxu0 %v73_v10  ;;  %v1044_v38 = vunpack.c.h.bf16 %v1367_v25  ;;  %v62_v39 = vunpack.c.h.bf16 %v29_v30  ;;  %v61_v40 = vunpack.c.l.bf16 %v29_v30  ;;  %v60_v42 = vunpack.c.h.bf16 %v28_v35  ;;  %v22_v2 = vld [vmem:[%s1816_s1 + $0x8] sm:$0xff]  ;;  %v21_v5 = vld [vmem:[%s1816_s1] sm:$0xff]  ;;  %v44_v8 = vld [vmem:[%s1816_s1 + $0xb8] sm:$0xff] }
   0x9   :  { %346 = vmatprep.subr.mxu0 %v72_v12  ;;  %vm296_vm1 = vcmp.lt.s32.totalorder %v1381_v37, 7  ;;  %vm228_vm2 = vcmp.lt.s32.totalorder %v1381_v37, 1  ;;  %v1043_v44 = vunpack.c.l.bf16 %v1367_v25  ;;  %v59_v49 = vunpack.c.l.bf16 %v28_v35  ;;  %v43_v11 = vld [vmem:[%s1816_s1 + $0xb0] sm:$0xff]  ;;  %v42_v14 = vld [vmem:[%s1816_s1 + $0xa8] sm:$0xff]  ;;  %v41_v17 = vld [vmem:[%s1816_s1 + $0xa0] sm:$0xff] }
   0xa   :  { %347 = vmatpush1.msra.mxu0 %v71_v13  ;;  %1175 = vmatpush3.msra.mxu1 %v1044_v38  ;;  %v299_v45 = vsel %vm296_vm1, %v292_v23, %v293_v27  ;;  %v1397_v46 = vsel %vm228_vm2, %v225_v32, %v222_v22  ;;  %v1401_v47 = vsel %vm296_vm1, %v293_v27, %v294_v31  ;;  %v58_v53 = vunpack.c.h.bf16 %v27_v43  ;;  %v40_v20 = vld [vmem:[%s1816_s1 + $0x98] sm:$0xff]  ;;  %v38_v27 = vld [vmem:[%s1816_s1 + $0x88] sm:$0xff]  ;;  %v37_v30 = vld [vmem:[%s1816_s1 + $0x80] sm:$0xff] }
   0xb   :  { %348 = vmatprep.subr.mxu0 %v70_v15  ;;  %v1405_v48 = vsel %vm228_vm2, %v222_v22, %v223_v26  ;;  %909 = vmatprep.mubr.msk.f32.mxu0 %vm325_vm0, %v299_v45  ;;  %v1413_v51 = vsel %vm296_vm1, %v294_v31, %v295_v33  ;;  %v1417_v52 = vsel %vm228_vm2, %v223_v26, %v224_v28  ;;  %v57_v55 = vunpack.c.l.bf16 %v27_v43 }
   0xc   :  { %349 = vmatpush1.msra.mxu0 %v69_v16  ;;  %v1421_v54 = vsel %vm296_vm1, %v295_v33, %v292_v23  ;;  %1176 = vmatprep.subr.mxu1 %v1290_v41  ;;  %v1429_v57 = vsel %vm228_vm2, %v224_v28, %v225_v32  ;;  %v56_v58 = vunpack.c.h.bf16 %v26_v50  ;;  %v55_v59 = vunpack.c.l.bf16 %v26_v50  ;;  %v39_v23 = vld [vmem:[%s1816_s1 + $0x90] sm:$0xff] }
   0xd   :  { %350 = vmatprep.subr.mxu0 %v68_v18  ;;  %1177 = vmatpush3.msra.mxu1 %v1043_v44  ;;  %v54_v61 = vunpack.c.h.bf16 %v25_v56  ;;  %v53_v62 = vunpack.c.l.bf16 %v25_v56  ;;  %v52_v0 = vunpack.c.h.bf16 %v24_v60  ;;  %v51_v1 = vunpack.c.l.bf16 %v24_v60 }
   0xe   :  { %351 = vmatpush1.msra.mxu0 %v67_v19  ;;  %1178 = vmatprep.subr.mxu1 %v1290_v41  ;;  %v50_v3 = vunpack.c.h.bf16 %v23_v63  ;;  %v49_v4 = vunpack.c.l.bf16 %v23_v63  ;;  %v48_v6 = vunpack.c.h.bf16 %v22_v2  ;;  %v47_v7 = vunpack.c.l.bf16 %v22_v2 }
   0xf   :  { %352 = vmatprep.subr.mxu0 %v66_v24  ;;  %v46_v9 = vunpack.c.h.bf16 %v21_v5  ;;  %v45_v10 = vunpack.c.l.bf16 %v21_v5  ;;  %v92_v12 = vunpack.c.h.bf16 %v44_v8  ;;  %v91_v13 = vunpack.c.l.bf16 %v44_v8 }
  0x10   :  { %353 = vmatpush1.msra.mxu0 %v65_v29  ;;  %v90_v15 = vunpack.c.h.bf16 %v43_v11  ;;  %v89_v16 = vunpack.c.l.bf16 %v43_v11  ;;  %v88_v18 = vunpack.c.h.bf16 %v42_v14  ;;  %v87_v19 = vunpack.c.l.bf16 %v42_v14 }
  0x11   :  { %354 = vmatprep.subr.mxu0 %v64_v34  ;;  %v86_v21 = vunpack.c.h.bf16 %v41_v17  ;;  %v85_v22 = vunpack.c.l.bf16 %v41_v17  ;;  %v84_v24 = vunpack.c.h.bf16 %v40_v20  ;;  %v83_v26 = vunpack.c.l.bf16 %v40_v20 }
  0x12   :  { %355 = vmatpush1.msra.mxu0 %v63_v36  ;;  %v82_v28 = vunpack.c.h.bf16 %v39_v23  ;;  %v81_v29 = vunpack.c.l.bf16 %v39_v23  ;;  %v80_v31 = vunpack.c.h.bf16 %v38_v27  ;;  %v79_v32 = vunpack.c.l.bf16 %v38_v27 }
  0x13   :  { %356 = vmatprep.subr.mxu0 %v62_v39  ;;  %v78_v33 = vunpack.c.h.bf16 %v37_v30  ;;  %v77_v34 = vunpack.c.l.bf16 %v37_v30  ;;  %v233_v35 = vadd.s32 8, %v1381_v37  ;;  %v240_v36 = vand.u32 15, %v1381_v37 }
  0x14   :  { %357 = vmatpush1.msra.mxu0 %v61_v40  ;;  %v234_v40 = vadd.s32 16, %v1381_v37 }
  0x15   :  { %358 = vmatprep.subr.mxu0 %v60_v42  ;;  %v247_v39 = vand.u32 15, %v233_v35  ;;  %vm1473_vm3 = vcmp.ge.s32.totalorder %v240_v36, 1 }
  0x16   :  { %359 = vmatpush1.msra.mxu0 %v59_v49  ;;  %v254_v45 = vand.u32 15, %v234_v40  ;;  %v235_v49 = vadd.s32 24, %v1381_v37  ;;  %v288_v50 = vsel %vm1473_vm3, %v1397_v46, 0.0 }
  0x17   :  { %360 = vmatprep.subr.mxu0 %v58_v53  ;;  %vm1477_vm4 = vcmp.lt.s32.totalorder %v247_v39, 15 }
  0x18   :  { %361 = vmatpush1.msra.mxu0 %v57_v55  ;;  %v306_v55 = vsel %vm1477_vm4, %v1401_v47, 0.0  ;;  %vm1489_vm5 = vcmp.ge.s32.totalorder %v254_v45, 1 }
  0x19   :  { %362 = vmatprep.subr.mxu0 %v56_v58  ;;  %v290_v46 = vsel %vm1489_vm5, %v1417_v52, 0.0  ;;  %v1515_v52 = vld [vmem:[%s1817_s2 + $0xf0] sm:$0xff]  }
  0x1a   :  { %363 = vmatpush1.msra.mxu0 %v55_v59  ;;  %v261_v59 = vand.u32 15, %v235_v49  ;;  %v1039_v2 = vunpack.c.l.bf16 %v1515_v52 }
  0x1b   :  { %364 = vmatprep.subr.mxu0 %v54_v61 }
  0x1c   :  { %365 = vmatpush1.msra.mxu0 %v53_v62  ;;  %vm1499_vm6 = vcmp.lt.s32.totalorder %v261_v59, 15 }
  0x1d   :  { %366 = vmatprep.subr.mxu0 %v52_v0 }
  0x1e   :  { %367 = vmatpush1.msra.mxu0 %v51_v1  ;;  %v308_v1 = vsel %vm1499_vm6, %v1421_v54, 0.0  ;;  %v1525_v54 = vld [vmem:[%s1817_s2 + $0xe8] sm:$0xff]  }
  0x1f   :  { %368 = vmatprep.subr.mxu0 %v50_v3  ;;  %v1035_v3 = vunpack.c.l.bf16 %v1525_v54 }
  0x20   :  { %369 = vmatpush1.msra.mxu0 %v49_v4  ;;  %v1538_v4 = vld [vmem:[%s1817_s2 + $0xe0] sm:$0xff]  }
  0x21   :  { %370 = vmatprep.subr.mxu0 %v48_v6  ;;  %v1032_v5 = vunpack.c.h.bf16 %v1538_v4  ;;  %v1031_v6 = vunpack.c.l.bf16 %v1538_v4 }
  0x22   :  { %371 = vmatpush1.msra.mxu0 %v47_v7  ;;  %v1551_v7 = vld [vmem:[%s1817_s2 + $0xd8] sm:$0xff]  }
  0x23   :  { %372 = vmatprep.subr.mxu0 %v46_v9  ;;  %v1028_v8 = vunpack.c.h.bf16 %v1551_v7  ;;  %v1027_v9 = vunpack.c.l.bf16 %v1551_v7 }
  0x24   :  { %373 = vmatpush1.msra.mxu0 %v45_v10  ;;  %v1564_v10 = vld [vmem:[%s1817_s2 + $0xd0] sm:$0xff]  }
  0x25   :  { %390 = vmatprep.subr.mxu0 %v92_v12  ;;  %v1024_v11 = vunpack.c.h.bf16 %v1564_v10  ;;  %v1023_v12 = vunpack.c.l.bf16 %v1564_v10 }
  0x26   :  { %391 = vmatpush2.msra.mxu0 %v91_v13  ;;  %v1577_v13 = vld [vmem:[%s1817_s2 + $0xc8] sm:$0xff]  }
  0x27   :  { %392 = vmatprep.subr.mxu0 %v90_v15  ;;  %v1020_v14 = vunpack.c.h.bf16 %v1577_v13  ;;  %v1019_v15 = vunpack.c.l.bf16 %v1577_v13 }
  0x28   :  { %393 = vmatpush2.msra.mxu0 %v89_v16  ;;  %v1586_v16 = vld [vmem:[%s1817_s2 + $0xc0] sm:$0xff]  }
  0x29   :  { %394 = vmatprep.subr.mxu0 %v88_v18  ;;  %v1016_v17 = vunpack.c.h.bf16 %v1586_v16  ;;  %v1015_v18 = vunpack.c.l.bf16 %v1586_v16 }
  0x2a   :  { %395 = vmatpush2.msra.mxu0 %v87_v19 }
  0x2b   :  { %396 = vmatprep.subr.mxu0 %v86_v21 }
  0x2c   :  { %397 = vmatpush2.msra.mxu0 %v85_v22 }
  0x2d   :  { %398 = vmatprep.subr.mxu0 %v84_v24 }
  0x2e   :  { %399 = vmatpush2.msra.mxu0 %v83_v26 }
  0x2f   :  { %400 = vmatprep.subr.mxu0 %v82_v28 }
  0x30   :  { %401 = vmatpush2.msra.mxu0 %v81_v29 }
  0x31   :  { %402 = vmatprep.subr.mxu0 %v80_v31 }
  0x32   :  { %403 = vmatpush2.msra.mxu0 %v79_v32 }
  0x33   :  { %404 = vmatprep.subr.mxu0 %v78_v33 }
  0x34   :  { %405 = vmatpush2.msra.mxu0 %v77_v34 }
  0x74   :  { %v314_v53 = vpop.permute.xlu0 %313  ;;  %v318_v60 = vpop.permute.xlu1 %317 }
  0x75   :  { %v326_v56 = vsel %vm325_vm0, %v288_v50, %v314_v53  ;;  %v328_v63 = vsel %vm325_vm0, %v290_v46, %v318_v60 }
  0x76   :  { %407 = vmatmul.mubr.f32.vlgmr.msra.gmra.mxu0 %v326_v56 }
  0x77   :  { %910 = vmatprep.mubr.msk.f32.mxu0 %vm325_vm0, %v306_v55 }
  0x78   :  { %v316_v61 = vpop.permute.xlu0 %315  ;;  %v320_v0 = vpop.permute.xlu1 %319 }
  0x79   :  { %v327_v62 = vsel %vm325_vm0, %v1405_v48, %v316_v61  ;;  %v329_v48 = vsel %vm325_vm0, %v1429_v57, %v320_v0  ;;  %v1036_v57 = vunpack.c.h.bf16 %v1525_v54 }
  0x7a   :  { %413 = vmatmul.mubr.f32.gmra.mxu0 %v327_v62 }
  0x7b   :  { %911 = vmatprep.mubr.msk.f32.mxu0 %vm325_vm0, %v1413_v51  ;;  %v1040_v51 = vunpack.c.h.bf16 %v1515_v52 }
  0x7d   :  { %1179 = vmatpush3.msra.mxu1 %v1040_v51 }
  0x7e   :  { %419 = vmatmul.mubr.f32.gmra.mxu0 %v328_v63  ;;  %1180 = vmatprep.subr.mxu1 %v1290_v41  ;;  %v1059_v63 = vld [vmem:[%s1817_s2 + $0x78] sm:$0xff]  }
  0x7f   :  { %912 = vmatprep.mubr.msk.f32.mxu0 %vm325_vm0, %v308_v1  ;;  %1181 = vmatpush3.msra.mxu1 %v1039_v2  ;;  %v980_v0 = vunpack.c.h.bf16 %v1059_v63  ;;  %v1051_v1 = vld [vmem:[%s1817_s2 + $0x38] sm:$0xff]  }
  0x80   :  { %1182 = vmatprep.subr.mxu1 %v1290_v41 }
  0x81   :  { %1183 = vmatpush3.msra.mxu1 %v1036_v57 }
  0x82   :  { %425 = vmatmul.mubr.f32.gmra.mxu0 %v329_v48  ;;  %1184 = vmatprep.subr.mxu1 %v1290_v41  ;;  %v1067_v48 = vld [vmem:[%s1817_s2 + $0xb8] sm:$0xff]  }
  0x83   :  { %1185 = vmatpush3.msra.mxu1 %v1035_v3 }
  0x84   :  { %1186 = vmatprep.subr.mxu1 %v1290_v41 }
  0x85   :  { %1187 = vmatpush3.msra.mxu1 %v1032_v5 }
  0x86   :  { %1188 = vmatprep.subr.mxu1 %v1290_v41 }
  0x87   :  { %1189 = vmatpush3.msra.mxu1 %v1031_v6 }
  0x88   :  { %1190 = vmatprep.subr.mxu1 %v1290_v41 }
  0x89   :  { %1191 = vmatpush3.msra.mxu1 %v1028_v8 }
  0x8a   :  { %1192 = vmatprep.subr.mxu1 %v1290_v41 }
  0x8b   :  { %1193 = vmatpush3.msra.mxu1 %v1027_v9 }
  0x8c   :  { %1194 = vmatprep.subr.mxu1 %v1290_v41 }
  0x8d   :  { %1195 = vmatpush3.msra.mxu1 %v1024_v11 }
  0x8e   :  { %1196 = vmatprep.subr.mxu1 %v1290_v41 }
  0x8f   :  { %1197 = vmatpush3.msra.mxu1 %v1023_v12 }
  0x90   :  { %1198 = vmatprep.subr.mxu1 %v1290_v41 }
  0x91   :  { %1199 = vmatpush3.msra.mxu1 %v1020_v14 }
  0x92   :  { %1200 = vmatprep.subr.mxu1 %v1290_v41 }
  0x93   :  { %1201 = vmatpush3.msra.mxu1 %v1019_v15 }
  0x94   :  { %1202 = vmatprep.subr.mxu1 %v1290_v41 }
  0x95   :  { %1203 = vmatpush3.msra.mxu1 %v1016_v17 }
  0x96   :  { %1204 = vmatprep.subr.mxu1 %v1290_v41 }
  0x97   :  { %1205 = vmatpush3.msra.mxu1 %v1015_v18 }
  0x98   :  { %1093 = vmatprep.subr.mxu1 %v980_v0 }
 0x136   :  { %v1604_v19 = vpop.f32.mrf.mxu0 }
 0x137   :  { %v448_v26 = vmul.f32 %v1604_v19, %v1604_v19 }
 0x138   :  { %v1606_v20 = vpop.f32.mrf.mxu0 }
 0x13a   :  { %v1608_v21 = vpop.f32.mrf.mxu0 }
 0x13b   :  { %v449_v23 = vmul.f32 %v1608_v21, %v1608_v21  ;;  %v439_v27 = vadd.f32 %v1608_v21, %v1604_v19 }
 0x13c   :  { %v1610_v22 = vpop.f32.mrf.mxu0 }
 0x13d   :  { %v452_v30 = vadd.f32 %v449_v23, %v448_v26  ;;  %v948_v23 = vunpack.c.h.bf16 %v1051_v1  ;;  %v1012_v26 = vunpack.c.h.bf16 %v1067_v48 }
 0x13e   :  { %v1614_v24 = vpop.f32.mrf.mxu0 }
 0x13f   :  { %v450_v28 = vmul.f32 %v1614_v24, %v1614_v24  ;;  %v440_v31 = vadd.f32 %v439_v27, %v1614_v24  ;;  %v979_v27 = vunpack.c.l.bf16 %v1059_v63  ;;  %1209 = vmatprep.subr.mxu0 %v1012_v26  ;;  %v1056_v63 = vld [vmem:[%s1817_s2 + $0x60] sm:$0xff]  }
 0x140   :  { %v1622_v29 = vpop.f32.mrf.mxu0  ;;  %1210 = vmatpush3.msra.mxu0 %v1012_v26  ;;  %v968_v0 = vunpack.c.h.bf16 %v1056_v63 }
 0x141   :  { %v453_v33 = vadd.f32 %v452_v30, %v450_v28  ;;  %v947_v28 = vunpack.c.l.bf16 %v1051_v1  ;;  %v1011_v30 = vunpack.c.l.bf16 %v1067_v48  ;;  %v1048_v1 = vld [vmem:[%s1817_s2 + $0x20] sm:$0xff]  }
 0x142   :  { %v1625_v32 = vpop.f32.mrf.mxu0  ;;  %v1064_v48 = vld [vmem:[%s1817_s2 + $0xa0] sm:$0xff]  }
 0x143   :  { %v441_v34 = vadd.f32 %v440_v31, %v1625_v32  ;;  %v451_v35 = vmul.f32 %v1625_v32, %v1625_v32  ;;  %v1058_v31 = vld [vmem:[%s1817_s2 + $0x70] sm:$0xff]   ;;  %1211 = vmatprep.subr.mxu0 %v1011_v30  ;;  %v1000_v26 = vunpack.c.h.bf16 %v1064_v48 }
 0x144   :  { %1212 = vmatpush3.msra.mxu0 %v1011_v30  ;;  %v999_v30 = vunpack.c.l.bf16 %v1064_v48  ;;  %v1061_v48 = vld [vmem:[%s1817_s2 + $0x88] sm:$0xff]   ;;  %v1790_v25 = vpop.f32.mrf.mxu0 }
 0x145   :  { %v442_v36 = vrot.slane %v441_v34, 4  ;;  %v454_v39 = vadd.f32 %v453_v33, %v451_v35  ;;  %v976_v33 = vunpack.c.h.bf16 %v1058_v31  ;;  %v1066_v35 = vld [vmem:[%s1817_s2 + $0xb0] sm:$0xff]  }
 0x147   :  { %v443_v40 = vadd.f32 %v442_v36, %v441_v34  ;;  %v455_v45 = vrot.slane %v454_v39, 4  ;;  %v1050_v34 = vld [vmem:[%s1817_s2 + $0x30] sm:$0xff]  }
 0x148   :  { %v944_v36 = vunpack.c.h.bf16 %v1050_v34 }
 0x149   :  { %v444_v49 = vrot.slane %v443_v40, 2  ;;  %v456_v50 = vadd.f32 %v455_v45, %v454_v39  ;;  %v1008_v39 = vunpack.c.h.bf16 %v1066_v35  ;;  %v943_v45 = vunpack.c.l.bf16 %v1050_v34  ;;  %v1047_v34 = vld [vmem:[%s1817_s2 + $0x18] sm:$0xff]  }
 0x14b   :  { %v445_v53 = vadd.f32 %v444_v49, %v443_v40  ;;  %v457_v55 = vrot.slane %v456_v50, 2  ;;  %v975_v40 = vunpack.c.l.bf16 %v1058_v31  ;;  %1213 = vmatprep.subr.mxu0 %v1008_v39  ;;  %v1007_v49 = vunpack.c.l.bf16 %v1066_v35  ;;  %v1055_v31 = vld [vmem:[%s1817_s2 + $0x58] sm:$0xff]  }
 0x14c   :  { %1214 = vmatpush3.msra.mxu0 %v1008_v39  ;;  %v1063_v35 = vld [vmem:[%s1817_s2 + $0x98] sm:$0xff]  }
 0x14d   :  { %v446_v56 = vrot.slane %v445_v53, 1  ;;  %v458_v59 = vadd.f32 %v457_v55, %v456_v50  ;;  %v1057_v50 = vld [vmem:[%s1817_s2 + $0x68] sm:$0xff]   ;;  %1215 = vmatprep.subr.mxu0 %v1007_v49  ;;  %v996_v39 = vunpack.c.h.bf16 %v1063_v35 }
 0x14e   :  { %v1049_v55 = vld [vmem:[%s1817_s2 + $0x28] sm:$0xff]   ;;  %1216 = vmatpush3.msra.mxu0 %v1007_v49  ;;  %v995_v49 = vunpack.c.l.bf16 %v1063_v35  ;;  %v1060_v35 = vld [vmem:[%s1817_s2 + $0x80] sm:$0xff]  }
 0x14f   :  { %v459_v60 = vrot.slane %v458_v59, 1  ;;  %v447_v61 = vadd.f32 %v446_v56, %v445_v53  ;;  %v972_v53 = vunpack.c.h.bf16 %v1057_v50  ;;  %v1065_v56 = vld [vmem:[%s1817_s2 + $0xa8] sm:$0xff]  }
 0x151   :  { %v460_v46 = vadd.f32 %v459_v60, %v458_v59  ;;  %v940_v59 = vunpack.c.h.bf16 %v1049_v55  ;;  %v1004_v60 = vunpack.c.h.bf16 %v1065_v56 }
 0x153   :  { %v462_v62 = vsel %vm461_vm8, %v447_v61, %v460_v46  ;;  %v971_v61 = vunpack.c.l.bf16 %v1057_v50  ;;  %1217 = vmatprep.subr.mxu0 %v1004_v60  ;;  %v939_v46 = vunpack.c.l.bf16 %v1049_v55  ;;  %v1054_v50 = vld [vmem:[%s1817_s2 + $0x50] sm:$0xff]  }
 0x154   :  { %1207 = vmatmul.mubr.f32.vlgmr.msra.gmra.mxu1 %v462_v62  ;;  %v1003_v62 = vunpack.c.l.bf16 %v1065_v56  ;;  %1218 = vmatpush3.msra.mxu0 %v1004_v60  ;;  %v1046_v55 = vld [vmem:[%s1817_s2 + $0x10] sm:$0xff]  }
 0x155   :  { %1094 = vmatpush3.msra.mxu1 %v948_v23  ;;  %v936_v23 = vunpack.c.h.bf16 %v1048_v1  ;;  %v1062_v56 = vld [vmem:[%s1817_s2 + $0x90] sm:$0xff]  }
 0x156   :  { %1095 = vmatprep.subr.mxu1 %v979_v27  ;;  %1219 = vmatprep.subr.mxu0 %v1003_v62  ;;  %v967_v27 = vunpack.c.l.bf16 %v1056_v63  ;;  %v992_v60 = vunpack.c.h.bf16 %v1062_v56  ;;  %v1053_v63 = vld [vmem:[%s1817_s2 + $0x48] sm:$0xff]  }
 0x157   :  { %1096 = vmatpush3.msra.mxu1 %v947_v28  ;;  %1220 = vmatpush3.msra.mxu0 %v1003_v62  ;;  %v935_v28 = vunpack.c.l.bf16 %v1048_v1  ;;  %v991_v62 = vunpack.c.l.bf16 %v1062_v56  ;;  %v1045_v1 = vld [vmem:[%s1817_s2 + $0x8] sm:$0xff]  }
 0x158   :  { %1097 = vmatprep.subr.mxu1 %v976_v33  ;;  %1221 = vmatprep.subr.mxu0 %v1000_v26  ;;  %v964_v33 = vunpack.c.h.bf16 %v1055_v31 }
 0x159   :  { %1098 = vmatpush3.msra.mxu1 %v944_v36  ;;  %1222 = vmatpush3.msra.mxu0 %v1000_v26  ;;  %v932_v36 = vunpack.c.h.bf16 %v1047_v34  ;;  %v988_v26 = vunpack.c.h.bf16 %v1061_v48 }
 0x15a   :  { %1099 = vmatprep.subr.mxu1 %v975_v40  ;;  %1223 = vmatprep.subr.mxu0 %v999_v30  ;;  %v963_v40 = vunpack.c.l.bf16 %v1055_v31  ;;  %v1052_v31 = vld [vmem:[%s1817_s2 + $0x40] sm:$0xff]  }
 0x15b   :  { %1100 = vmatpush3.msra.mxu1 %v943_v45  ;;  %1224 = vmatpush3.msra.mxu0 %v999_v30  ;;  %v931_v45 = vunpack.c.l.bf16 %v1047_v34  ;;  %v987_v30 = vunpack.c.l.bf16 %v1061_v48  ;;  %v918_v34 = vld [vmem:[%s1817_s2] sm:$0xff]  }
 0x15c   :  { %1101 = vmatprep.subr.mxu1 %v972_v53  ;;  %1225 = vmatprep.subr.mxu0 %v996_v39  ;;  %v960_v53 = vunpack.c.h.bf16 %v1054_v50 }
 0x15d   :  { %1102 = vmatpush3.msra.mxu1 %v940_v59  ;;  %1226 = vmatpush3.msra.mxu0 %v996_v39  ;;  %v928_v59 = vunpack.c.h.bf16 %v1046_v55  ;;  %v984_v39 = vunpack.c.h.bf16 %v1060_v35 }
 0x15e   :  { %1103 = vmatprep.subr.mxu1 %v971_v61  ;;  %1227 = vmatprep.subr.mxu0 %v995_v49  ;;  %v959_v61 = vunpack.c.l.bf16 %v1054_v50 }
 0x15f   :  { %1104 = vmatpush3.msra.mxu1 %v939_v46  ;;  %1228 = vmatpush3.msra.mxu0 %v995_v49  ;;  %v927_v46 = vunpack.c.l.bf16 %v1046_v55  ;;  %v983_v49 = vunpack.c.l.bf16 %v1060_v35 }
 0x160   :  { %1105 = vmatprep.subr.mxu1 %v968_v0  ;;  %1229 = vmatprep.subr.mxu0 %v992_v60  ;;  %v956_v0 = vunpack.c.h.bf16 %v1053_v63 }
 0x161   :  { %1106 = vmatpush3.msra.mxu1 %v936_v23  ;;  %1230 = vmatpush3.msra.mxu0 %v992_v60  ;;  %v924_v23 = vunpack.c.h.bf16 %v1045_v1 }
 0x162   :  { %1107 = vmatprep.subr.mxu1 %v967_v27  ;;  %1231 = vmatprep.subr.mxu0 %v991_v62  ;;  %v955_v27 = vunpack.c.l.bf16 %v1053_v63  ;;  %v1707_v63 = vld [vmem:[%s1818_s3] sm:$0xff] }
 0x163   :  { %1108 = vmatpush3.msra.mxu1 %v935_v28  ;;  %1232 = vmatpush3.msra.mxu0 %v991_v62  ;;  %v923_v28 = vunpack.c.l.bf16 %v1045_v1 }
 0x164   :  { %1109 = vmatprep.subr.mxu1 %v964_v33  ;;  %1233 = vmatprep.subr.mxu0 %v988_v26  ;;  %v952_v33 = vunpack.c.h.bf16 %v1052_v31 }
 0x165   :  { %1110 = vmatpush3.msra.mxu1 %v932_v36  ;;  %1234 = vmatpush3.msra.mxu0 %v988_v26  ;;  %v920_v36 = vunpack.c.h.bf16 %v918_v34 }
 0x166   :  { %1111 = vmatprep.subr.mxu1 %v963_v40  ;;  %1235 = vmatprep.subr.mxu0 %v987_v30  ;;  %v951_v40 = vunpack.c.l.bf16 %v1052_v31 }
 0x167   :  { %1112 = vmatpush3.msra.mxu1 %v931_v45  ;;  %1236 = vmatpush3.msra.mxu0 %v987_v30  ;;  %v919_v45 = vunpack.c.l.bf16 %v918_v34 }
 0x168   :  { %1113 = vmatprep.subr.mxu1 %v960_v53  ;;  %1237 = vmatprep.subr.mxu0 %v984_v39 }
 0x169   :  { %1114 = vmatpush3.msra.mxu1 %v928_v59  ;;  %1238 = vmatpush3.msra.mxu0 %v984_v39 }
 0x16a   :  { %1115 = vmatprep.subr.mxu1 %v959_v61  ;;  %1239 = vmatprep.subr.mxu0 %v983_v49 }
 0x16b   :  { %1116 = vmatpush3.msra.mxu1 %v927_v46  ;;  %1240 = vmatpush3.msra.mxu0 %v983_v49 }
 0x16c   :  { %1117 = vmatprep.subr.mxu1 %v956_v0  ;;  %v552_v0 = vsub.s32 0, %v1381_v37 }
 0x16d   :  { %1118 = vmatpush3.msra.mxu1 %v924_v23 }
 0x16e   :  { %1119 = vmatprep.subr.mxu1 %v955_v27  ;;  %v560_v27 = vsub.s32 1, %v1381_v37 }
 0x16f   :  { %1120 = vmatpush3.msra.mxu1 %v923_v28 }
 0x170   :  { %1121 = vmatprep.subr.mxu1 %v952_v33 }
 0x171   :  { %1122 = vmatpush3.msra.mxu1 %v920_v36 }
 0x172   :  { %1123 = vmatprep.subr.mxu1 %v951_v40 }
 0x173   :  { %1124 = vmatpush3.msra.mxu1 %v919_v45 }
 0x174   :  { %1247 = vmatprep.subr.mxu1 %v1290_v41 }
 0x214   :  { %v529_v50 = vpop.f32.mrf.mxu1 }
 0x215   :  { %v533_v53 = vmul.f32 %v529_v50, %v529_v50 }
 0x216   :  { %v1208_v55 = vpop.f32.mrf.mxu1 }
 0x217   :  { %v535_v56 = vrot.slane %v533_v53, 7 }
 0x219   :  { %v537_v59 = vsub.f32 %v529_v50, %v535_v56 }
 0x21b   :  { %v538_v60 = vmax.f32 %v537_v59, 0.0 }
 0x21d   :  { %v539_v61 = vadd.f32 1e-05, %v538_v60 }
 0x21f   :  { %1285 = vrsqrt.f32 %v539_v61 }
 0x22c   :  { %v1286_v46 = vpop.eup %1285 }
 0x22d   :  { %v542_v62 = vrot.slane %v1286_v46, 1 }
 0x22f   :  { %v544_v1 = vmul.f32 %v542_v62, %v1707_v63 }
 0x231   :  { %v545_v48 = vmul.f32 %v544_v1, %v529_v50  ;;  %v553_v23 = vrot.slane %v544_v1, %v552_v0 }
 0x233   :  { %v547_v26 = vrot.slane %v545_v48, 7  ;;  %v556_v30 = vmul.f32 %v553_v23, %v1614_v24  ;;  %v557_v31 = vmul.f32 %v553_v23, %v1625_v32  ;;  %v554_v34 = vmul.f32 %v553_v23, %v1604_v19 }
 0x234   :  { %v555_v35 = vmul.f32 %v553_v23, %v1608_v21 }
 0x235   :  { %v549_v28 = vsub.f32 %v1707_v63, %v547_v26 }
 0x237   :  { %v561_v33 = vrot.slane %v549_v28, %v560_v27 }
 0x239   :  { %v564_v36 = vadd.f32 %v561_v33, %v556_v30  ;;  %v562_v39 = vadd.f32 %v561_v33, %v554_v34  ;;  %v565_v40 = vadd.f32 %v561_v33, %v557_v31  ;;  %v563_v45 = vadd.f32 %v561_v33, %v555_v35 }
 0x23b   :  { %v568_v49 = vmax.f32 %v564_v36, 0.0  ;;  %v566_v50 = vmax.f32 %v562_v39, 0.0  ;;  %v569_v53 = vmax.f32 %v565_v40, 0.0  ;;  %v567_v55 = vmax.f32 %v563_v45, 0.0 }
 0x23d   :  { %v570_v56 = vrot.slane %v566_v50, 7  ;;  %658 = vmatprep.mubr.f32.mxu1 %v566_v50  ;;  %v573_v59 = vrot.slane %v569_v53, 7  ;;  %v582_v60 = vrot.slane %v566_v50, 1  ;;  %v583_v24 = vrot.slane %v567_v55, 1 }
 0x23e   :  { %v584_v61 = vrot.slane %v568_v49, 1  ;;  %v585_v32 = vrot.slane %v569_v53, 1  ;;  %v571_v46 = vrot.slane %v567_v55, 7  ;;  %v572_v42 = vrot.slane %v568_v49, 7 }
 0x23f   :  { %v577_v19 = vsel %vm228_vm2, %v573_v59, %v570_v56  ;;  %v588_v21 = vsel %vm296_vm1, %v582_v60, %v583_v24 }
 0x240   :  { %913 = vmatmul.mubr.msk.f32.vlgmr.msra.gmra.mxu1 %vm1473_vm3, %v577_v19  ;;  %1241 = vmatprep.mubr.f32.mxu0 %v588_v21  ;;  %v587_v62 = vsel %vm296_vm1, %v583_v24, %v584_v61  ;;  %v586_v0 = vsel %vm296_vm1, %v584_v61, %v585_v32  ;;  %v576_v1 = vsel %vm228_vm2, %v570_v56, %v571_v46 }
 0x241   :  { %663 = vmatprep.mubr.f32.mxu1 %v567_v55  ;;  %1242 = vmatmul.mubr.msk.f32.vlgmr.msra.gmra.mxu0 %vm1477_vm4, %v587_v62  ;;  %v589_v48 = vsel %vm296_vm1, %v585_v32, %v582_v60  ;;  %v574_v43 = vsel %vm228_vm2, %v572_v42, %v573_v59 }
 0x242   :  { %1244 = vmatprep.mubr.f32.mxu0 %v586_v0  ;;  %1248 = vmatpush3.msra.mxu1 %v1044_v38  ;;  %v575_v38 = vsel %vm228_vm2, %v571_v46, %v572_v42 }
 0x243   :  { %1249 = vmatprep.subr.mxu1 %v1290_v41 }
 0x244   :  { %664 = vmatmul.mubr.f32.gmra.mxu1 %v576_v1  ;;  %v879_v1 = vsub.s32 2, %v1381_v37 }
 0x245   :  { %668 = vmatprep.mubr.f32.mxu1 %v568_v49  ;;  %1245 = vmatmul.mubr.msk.f32.gmra.mxu0 %vm1499_vm6, %v589_v48  ;;  %v433_v48 = vsub.s32 4, %v1381_v37 }
 0x246   :  { %1250 = vmatpush3.msra.mxu1 %v1043_v44 }
 0x247   :  { %1251 = vmatprep.subr.mxu1 %v1290_v41 }
 0x248   :  { %914 = vmatmul.mubr.msk.f32.gmra.mxu1 %vm1489_vm5, %v575_v38 }
 0x249   :  { %673 = vmatprep.mubr.f32.mxu1 %v569_v53  ;;  %1252 = vmatpush3.msra.mxu1 %v1040_v51 }
 0x24a   :  { %1253 = vmatprep.subr.mxu1 %v1290_v41 }
 0x24b   :  { %1254 = vmatpush3.msra.mxu1 %v1039_v2 }
 0x24c   :  { %674 = vmatmul.mubr.f32.gmra.mxu1 %v574_v43  ;;  %1255 = vmatprep.subr.mxu1 %v1290_v41 }
 0x24d   :  { %1256 = vmatpush3.msra.mxu1 %v1036_v57  ;;  %1279 = vmatprep.mubr.msk.f32.mxu1 %vm1291_vm7, %v1290_v41 }
 0x24e   :  { %1257 = vmatprep.subr.mxu1 %v1290_v41 }
 0x24f   :  { %1258 = vmatpush3.msra.mxu1 %v1035_v3 }
 0x250   :  { %1259 = vmatprep.subr.mxu1 %v1290_v41 }
 0x251   :  { %1260 = vmatpush3.msra.mxu1 %v1032_v5 }
 0x252   :  { %1261 = vmatprep.subr.mxu1 %v1290_v41 }
 0x253   :  { %1262 = vmatpush3.msra.mxu1 %v1031_v6 }
 0x254   :  { %1263 = vmatprep.subr.mxu1 %v1290_v41 }
 0x255   :  { %1264 = vmatpush3.msra.mxu1 %v1028_v8 }
 0x256   :  { %1265 = vmatprep.subr.mxu1 %v1290_v41 }
 0x257   :  { %1266 = vmatpush3.msra.mxu1 %v1027_v9 }
 0x258   :  { %1267 = vmatprep.subr.mxu1 %v1290_v41 }
 0x259   :  { %1268 = vmatpush3.msra.mxu1 %v1024_v11 }
 0x25a   :  { %1269 = vmatprep.subr.mxu1 %v1290_v41 }
 0x25b   :  { %1270 = vmatpush3.msra.mxu1 %v1023_v12 }
 0x25c   :  { %1271 = vmatprep.subr.mxu1 %v1290_v41 }
 0x25d   :  { %1272 = vmatpush3.msra.mxu1 %v1020_v14 }
 0x25e   :  { %1273 = vmatprep.subr.mxu1 %v1290_v41 }
 0x25f   :  { %1274 = vmatpush3.msra.mxu1 %v1019_v15 }
 0x260   :  { %1275 = vmatprep.subr.mxu1 %v1290_v41 }
 0x261   :  { %1276 = vmatpush3.msra.mxu1 %v1016_v17 }
 0x262   :  { %1277 = vmatprep.subr.mxu1 %v1290_v41 }
 0x263   :  { %1278 = vmatpush3.msra.mxu1 %v1015_v18 }
 0x300   :  { %v1125_v44 = vpop.f32.mrf.mxu1 }
 0x301   :  { %v1243_v58 = vpop.f32.mrf.mxu0 }
 0x302   :  { %v1126_v47 = vpop.f32.mrf.mxu1 }
 0x303   :  { %v745_v52 = vpop.f32.mrf.mxu0  ;;  %v1127_v54 = vadd.f32 %v1126_v47, %v1125_v44  ;;  %v434_v47 = vrot.slane %v1707_v63, %v433_v48 }
 0x304   :  { %v1128_v51 = vpop.f32.mrf.mxu1 }
 0x305   :  { %v1246_v3 = vpop.f32.mrf.mxu0  ;;  %v746_v7 = vadd.f32 %v1127_v54, %v745_v52 }
 0x306   :  { %v1129_v2 = vpop.f32.mrf.mxu1 }
 0x307   :  { %v1130_v57 = vadd.f32 %v1129_v2, %v1128_v51  ;;  %v755_v41 = vpop.f32.mrf.mxu0  ;;  %v773_v13 = vmul.f32 %v746_v7, %v746_v7 }
 0x308   :  { %v1131_v4 = vpop.f32.mrf.mxu1 }
 0x309   :  { %v751_v5 = vadd.f32 %v1243_v58, %v1130_v57  ;;  %v887_v58 = vsub.s32 3, %v1381_v37 }
 0x30a   :  { %v1132_v6 = vpop.f32.mrf.mxu1 }
 0x30b   :  { %v1133_v8 = vadd.f32 %v1132_v6, %v1131_v4  ;;  %v774_v10 = vmul.f32 %v751_v5, %v751_v5  ;;  %v764_v14 = vadd.f32 %v751_v5, %v746_v7  ;;  %v435_v4 = vadd.f32 %v434_v47, %v1606_v20 }
 0x30c   :  { %v1134_v9 = vpop.f32.mrf.mxu1  ;;  %v436_v6 = vadd.f32 %v434_v47, %v1610_v22 }
 0x30d   :  { %v756_v11 = vadd.f32 %v1133_v8, %v755_v41  ;;  %v777_v17 = vadd.f32 %v774_v10, %v773_v13  ;;  %v437_v8 = vadd.f32 %v434_v47, %v1622_v29  ;;  %v438_v41 = vadd.f32 %v434_v47, %v1790_v25 }
 0x30e   :  { %v1135_v12 = vpop.f32.mrf.mxu1 }
 0x30f   :  { %v775_v15 = vmul.f32 %v756_v11, %v756_v11  ;;  %v1136_v16 = vadd.f32 %v1135_v12, %v1134_v9  ;;  %v765_v18 = vadd.f32 %v764_v14, %v756_v11 }
 0x311   :  { %v761_v23 = vadd.f32 %v1246_v3, %v1136_v16  ;;  %v778_v26 = vadd.f32 %v777_v17, %v775_v15 }
 0x313   :  { %v766_v27 = vadd.f32 %v765_v18, %v761_v23  ;;  %v776_v28 = vmul.f32 %v761_v23, %v761_v23 }
 0x315   :  { %v767_v30 = vrot.slane %v766_v27, 4  ;;  %v779_v31 = vadd.f32 %v778_v26, %v776_v28 }
 0x317   :  { %v768_v33 = vadd.f32 %v767_v30, %v766_v27  ;;  %v780_v34 = vrot.slane %v779_v31, 4 }
 0x319   :  { %v769_v35 = vrot.slane %v768_v33, 2  ;;  %v781_v36 = vadd.f32 %v780_v34, %v779_v31 }
 0x31b   :  { %v770_v39 = vadd.f32 %v769_v35, %v768_v33  ;;  %v782_v40 = vrot.slane %v781_v36, 2 }
 0x31d   :  { %v771_v45 = vrot.slane %v770_v39, 1  ;;  %v783_v49 = vadd.f32 %v782_v40, %v781_v36 }
 0x31f   :  { %v784_v50 = vrot.slane %v783_v49, 1  ;;  %v772_v53 = vadd.f32 %v771_v45, %v770_v39 }
 0x321   :  { %v785_v55 = vadd.f32 %v784_v50, %v783_v49 }
 0x323   :  { %v786_v56 = vsel %vm461_vm8, %v772_v53, %v785_v55 }
 0x324   :  { %1280 = vmatmul.mubr.f32.vlgmr.msra.gmra.mxu1 %v786_v56 }
 0x3e4   :  { %v853_v59 = vpop.f32.mrf.mxu1 }
 0x3e5   :  { %v857_v60 = vmul.f32 %v853_v59, %v853_v59 }
 0x3e6   :  { %v1281_v24 = vpop.f32.mrf.mxu1 }
 0x3e7   :  { %v859_v61 = vrot.slane %v857_v60, 7 }
 0x3e9   :  { %v861_v32 = vsub.f32 %v853_v59, %v859_v61 }
 0x3eb   :  { %v862_v19 = vmax.f32 %v861_v32, 0.0 }
 0x3ed   :  { %v863_v21 = vadd.f32 1e-05, %v862_v19 }
 0x3ef   :  { %1287 = vrsqrt.f32 %v863_v21 }
 0x3fc   :  { %v1288_v46 = vpop.eup %1287 }
 0x3fd   :  { %v866_v62 = vrot.slane %v1288_v46, 7 }
 0x3ff   :  { %v868_v0 = vmul.f32 %v866_v62, %v1707_v63 }
 0x401   :  { %v870_v42 = vrot.slane %v868_v0, 2  ;;  %v880_v43 = vrot.slane %v868_v0, %v879_v1 }
 0x403   :  { %v872_v38 = vmul.f32 %v870_v42, %v853_v59  ;;  %v881_v51 = vmul.f32 %v880_v43, %v746_v7  ;;  %v882_v2 = vmul.f32 %v880_v43, %v751_v5  ;;  %v883_v54 = vmul.f32 %v880_v43, %v756_v11 }
 0x404   :  { %v884_v57 = vmul.f32 %v880_v43, %v761_v23 }
 0x405   :  { %v874_v44 = vrot.slane %v872_v38, 5 }
 0x407   :  { %v876_v52 = vsub.f32 %v1707_v63, %v874_v44 }
 0x409   :  { %v888_v3 = vrot.slane %v876_v52, %v887_v58 }
 0x40b   :  { %v889_v9 = vadd.f32 %v888_v3, %v881_v51  ;;  %v890_v10 = vadd.f32 %v888_v3, %v882_v2  ;;  %v891_v37 = vadd.f32 %v888_v3, %v883_v54  ;;  %v892_v12 = vadd.f32 %v888_v3, %v884_v57 }
 0x40d   :  { %v893_v13 = vadd.f32 %v889_v9, %v435_v4  ;;  %v894_v14 = vadd.f32 %v890_v10, %v436_v6  ;;  %v895_v63 = vadd.f32 %v891_v37, %v437_v8  ;;  %v896_v7 = vadd.f32 %v892_v12, %v438_v41 }
 0x40f   :  { %v897_v5 = vmax.f32 %v893_v13, 0.0  ;;  %v898_v11 = vmax.f32 %v894_v14, 0.0  ;;  %v899_v15 = vmax.f32 %v895_v63, 0.0  ;;  %v900_v16 = vmax.f32 %v896_v7, 0.0 }
 0x411   :  { %901 = vst [vmem:[%s1819_s4] sm:$0xff] %v897_v5  ;;  %902 = vst [vmem:[%s1819_s4 + $0x8] sm:$0xff] %v898_v11 }
 0x412   :  { %903 = vst [vmem:[%s1819_s4 + $0x10] sm:$0xff] %v899_v15  ;;  %904 = vst [vmem:[%s1819_s4 + $0x18] sm:$0xff] %v900_v16 }

</bundles_post_ra>
